<compile_context>
chip_gen: v7x
topology: tpu7x:2x2x1
jax: 0.10.0
libtpu: 0.0.40
codegen_flags: <defaults>
</compile_context>

<pallas_src>
import functools

import jax
import jax.numpy as jnp
from jax.experimental import pallas as pl
from jax.experimental.pallas import tpu as pltpu


def _round_up(x, m):
    return ((x + m - 1) // m) * m


def _tiling(batch, batch_tile):
    """Pick (tile, num_tiles, padded_batch) with lane-multiple tiles.

    Pads the batch only to a 128 multiple, then balances tiles across the grid
    (so a ~33k batch does not round up to 65536 columns) and forces >= 2 tiles
    whenever possible so v7x can shard the 'parallel' axis across both cores.
    """
    b128 = _round_up(max(batch, 1), 128)
    tb0 = min(batch_tile, b128)
    num_tiles = -(-b128 // tb0)
    if b128 >= 256:
        num_tiles = max(num_tiles, 2)
    tb = _round_up(-(-b128 // num_tiles), 128)
    b_pad = num_tiles * tb
    return tb, num_tiles, b_pad


def _mlp_kernel(x_ref, p_ref, o_ref):
    # x_ref: (4, TB)  4 iris features on sublanes, batch on lanes.
    # p_ref: (32, 8)  packed params:
    #   rows  0: 8, cols 0:4  -> W1 (8, 4)
    #   rows  8:16            -> W2 (8, 8)
    #   rows 16:20            -> W3 padded to (4, 8), row 3 zero
    #   rows 24:32            -> bias columns: col0 = b1, col1 = b2, col2 = b3 (4 rows)
    # o_ref: (4, TB)  rows 0:3 = logits, row 3 = 0.
    x = x_ref[...]

    w1 = p_ref[0:8, 0:4]      # (8, 4)
    w2 = p_ref[8:16, :]       # (8, 8)
    w3 = p_ref[16:20, :]      # (4, 8), row 3 is zero
    b1 = p_ref[24:32, 0:1]    # (8, 1) -> broadcasts across TB lanes
    b2 = p_ref[24:32, 1:2]    # (8, 1)
    b3 = p_ref[24:28, 2:3]    # (4, 1), row 3 is zero

    h1 = jnp.maximum(jnp.dot(w1, x, preferred_element_type=jnp.float32) + b1, 0.0)
    h2 = jnp.maximum(jnp.dot(w2, h1, preferred_element_type=jnp.float32) + b2, 0.0)
    out = jnp.dot(w3, h2, preferred_element_type=jnp.float32) + b3
    o_ref[...] = out.astype(o_ref.dtype)


def _pack_params(params):
    """Pack w1,b1,w2,b2,w3,b3 (PyTorch (out, in) layout) into one (32, 8) f32 slab."""
    p = jnp.zeros((32, 8), jnp.float32)
    p = p.at[0:8, 0:4].set(params["w1"].astype(jnp.float32))    # (8, 4)
    p = p.at[8:16, :].set(params["w2"].astype(jnp.float32))     # (8, 8)
    p = p.at[16:19, :].set(params["w3"].astype(jnp.float32))    # (3, 8); row 19 stays 0
    p = p.at[24:32, 0].set(params["b1"].astype(jnp.float32))    # (8,)
    p = p.at[24:32, 1].set(params["b2"].astype(jnp.float32))    # (8,)
    p = p.at[24:27, 2].set(params["b3"].astype(jnp.float32))    # (3,); row 27 stays 0
    return p


def _forward_feature_major(x_fb, packed, *, batch_tile):
    """x_fb: (4, B) f32, features on sublanes / batch on lanes. Returns (4, B_pad)."""
    B = x_fb.shape[1]
    tb, num_tiles, b_pad = _tiling(B, batch_tile)
    x_pad = x_fb if b_pad == B else jnp.pad(x_fb, ((0, 0), (0, b_pad - B)))

    flops = 2 * b_pad * (4 * 8 + 8 * 8 + 8 * 3)
    bytes_accessed = (4 * b_pad * 4) * 2 + 32 * 8 * 4  # in slab + out slab + params

    return pl.pallas_call(
        _mlp_kernel,
        out_shape=jax.ShapeDtypeStruct((4, b_pad), jnp.float32),
        grid_spec=pltpu.PrefetchScalarGridSpec(
            num_scalar_prefetch=0,
            grid=(num_tiles,),
            in_specs=[
                pl.BlockSpec((4, tb), lambda i: (0, i)),    # streamed batch tile
                pl.BlockSpec((32, 8), lambda i: (0, 0)),    # VMEM-resident packed params
            ],
            out_specs=pl.BlockSpec((4, tb), lambda i: (0, i)),
        ),
        compiler_params=pltpu.CompilerParams(
            dimension_semantics=("parallel",),
        ),
        cost_estimate=pl.CostEstimate(
            flops=flops, transcendentals=0, bytes_accessed=bytes_accessed
        ),
    )(x_pad, packed)


@functools.partial(jax.jit, static_argnames=("batch_tile",))
def iris_classifier_forward(x, params, *, batch_tile=32768):
    """PyTorch-compatible entry point. x: (B, 4) -> logits (B, 3).

    Pad/transpose + pallas_call + slice all live under one jit. For maximum
    throughput at large B prefer `iris_classifier_forward_feature_major`, which
    skips the layout transposes entirely.
    """
    B = x.shape[0]
    out = _forward_feature_major(x.astype(jnp.float32).T, _pack_params(params),
                                 batch_tile=batch_tile)
    return out[:3, :B].T


@functools.partial(jax.jit, static_argnames=("batch_tile",))
def iris_classifier_forward_feature_major(x_fb, params, *, batch_tile=32768):
    """Fast path: x_fb is (4, B) feature-major; returns (3, B) logits feature-major."""
    B = x_fb.shape[1]
    out = _forward_feature_major(x_fb.astype(jnp.float32), _pack_params(params),
                                 batch_tile=batch_tile)
    return out[:3, :B]


def init_params(key):
    """Deterministic init mirroring nn.Linear default U[-1/sqrt(fan_in), 1/sqrt(fan_in)].

    Weights use the PyTorch layout (out_features, in_features); biases are (out_features,).
    """
    def linear(key, fan_in, fan_out):
        kw, kb = jax.random.split(key)
        bound = 1.0 / jnp.sqrt(fan_in)
        w = jax.random.uniform(kw, (fan_out, fan_in), jnp.float32, -bound, bound)
        b = jax.random.uniform(kb, (fan_out,), jnp.float32, -bound, bound)
        return w, b

    k1, k2, k3 = jax.random.split(key, 3)
    w1, b1 = linear(k1, 4, 8)
    w2, b2 = linear(k2, 8, 8)
    w3, b3 = linear(k3, 8, 3)
    return {"w1": w1, "b1": b1, "w2": w2, "b2": b2, "w3": w3, "b3": b3}


def _reference_forward(x, p):
    h1 = jnp.maximum(x @ p["w1"].T + p["b1"], 0.0)
    h2 = jnp.maximum(h1 @ p["w2"].T + p["b2"], 0.0)
    return h2 @ p["w3"].T + p["b3"]


if __name__ == "__main__":
    key = jax.random.PRNGKey(0)
    k_params, k_x, k_x2 = jax.random.split(key, 3)

    params = init_params(k_params)

    # Small batch (single 128-lane tile).
    x = jax.random.normal(k_x, (8, 4), dtype=jnp.float32)  # batch=8, 4 iris features
    out = jax.block_until_ready(iris_classifier_forward(x, params))
    ref = _reference_forward(x, params)
    assert out.shape == (8, 3)
    assert jnp.allclose(out, ref, atol=1e-5, rtol=1e-5)

    # Multi-tile grid path (exercises the 2-tile 'parallel' split).
    x2 = jax.random.normal(k_x2, (300, 4), dtype=jnp.float32)
    out2 = jax.block_until_ready(iris_classifier_forward(x2, params))
    ref2 = _reference_forward(x2, params)
    assert out2.shape == (300, 3)
    assert jnp.allclose(out2, ref2, atol=1e-5, rtol=1e-5)

    # Feature-major fast path (no wrapper transposes).
    out_fb = jax.block_until_ready(
        iris_classifier_forward_feature_major(x2.T, params))
    assert jnp.allclose(out_fb.T, ref2, atol=1e-5, rtol=1e-5)

    print("KERNEL_OK")
</pallas_src>

<mosaic_0001>
module attributes {stable_mosaic.version = 11 : i64} {
  func.func @_mlp_kernel(%arg0: i32, %arg1: memref<4x128xf32, #tpu.memory_space<vmem>>, %arg2: memref<32x8xf32, #tpu.memory_space<vmem>>, %arg3: memref<4x128xf32, #tpu.memory_space<vmem>>) attributes {dimension_semantics = [#tpu.dimension_semantics<parallel>], iteration_bounds = array<i64: 1>, scalar_prefetch = 0 : i64, scratch_operands = 0 : i64, tpu.core_type = #tpu.core_type<tc>, window_params = [{transform_indices = @transform_0, window_bounds = array<i64: 4, 128>}, {pipeline_mode = #tpu.pipeline_mode<synchronous>, transform_indices = @transform_1, window_bounds = array<i64: 32, 8>}, {transform_indices = @transform_2, window_bounds = array<i64: 4, 128>}]} {
    %c0 = arith.constant 0 : index
    %c0_0 = arith.constant 0 : index
    %0 = vector.load %arg1[%c0, %c0_0] : memref<4x128xf32, #tpu.memory_space<vmem>>, vector<4x128xf32>
    %c0_1 = arith.constant 0 : index
    %c0_2 = arith.constant 0 : index
    %1 = vector.load %arg2[%c0_1, %c0_2] : memref<32x8xf32, #tpu.memory_space<vmem>>, vector<8x4xf32>
    %c8 = arith.constant 8 : index
    %c0_3 = arith.constant 0 : index
    %2 = vector.load %arg2[%c8, %c0_3] : memref<32x8xf32, #tpu.memory_space<vmem>>, vector<8x8xf32>
    %c16 = arith.constant 16 : index
    %c0_4 = arith.constant 0 : index
    %3 = vector.load %arg2[%c16, %c0_4] : memref<32x8xf32, #tpu.memory_space<vmem>>, vector<4x8xf32>
    %c24 = arith.constant 24 : index
    %c0_5 = arith.constant 0 : index
    %4 = vector.load %arg2[%c24, %c0_5] : memref<32x8xf32, #tpu.memory_space<vmem>>, vector<8x1xf32>
    %c24_6 = arith.constant 24 : index
    %c1 = arith.constant 1 : index
    %5 = vector.load %arg2[%c24_6, %c1] : memref<32x8xf32, #tpu.memory_space<vmem>>, vector<8x1xf32>
    %c24_7 = arith.constant 24 : index
    %c2 = arith.constant 2 : index
    %6 = vector.load %arg2[%c24_7, %c2] : memref<32x8xf32, #tpu.memory_space<vmem>>, vector<4x1xf32>
    %cst = arith.constant dense<0.000000e+00> : vector<8x128xf32>
    %7 = tpu.matmul %1, %0, %cst {dimension_numbers = #tpu.dot_dimension_numbers<[1], [0], [0], [1], [0, 0, 1, 1], [], []>} : vector<8x4xf32>, vector<4x128xf32>, vector<8x128xf32> -> vector<8x128xf32>
    %8 = vector.broadcast %4 : vector<8x1xf32> to vector<8x128xf32>
    %9 = arith.addf %7, %8 : vector<8x128xf32>
    %cst_8 = arith.constant 0.000000e+00 : f32
    %10 = vector.broadcast %cst_8 : f32 to vector<8x128xf32>
    %11 = arith.maximumf %9, %10 : vector<8x128xf32>
    %cst_9 = arith.constant dense<0.000000e+00> : vector<8x128xf32>
    %12 = tpu.matmul %2, %11, %cst_9 {dimension_numbers = #tpu.dot_dimension_numbers<[1], [0], [0], [1], [0, 0, 1, 1], [], []>} : vector<8x8xf32>, vector<8x128xf32>, vector<8x128xf32> -> vector<8x128xf32>
    %13 = vector.broadcast %5 : vector<8x1xf32> to vector<8x128xf32>
    %14 = arith.addf %12, %13 : vector<8x128xf32>
    %cst_10 = arith.constant 0.000000e+00 : f32
    %15 = vector.broadcast %cst_10 : f32 to vector<8x128xf32>
    %16 = arith.maximumf %14, %15 : vector<8x128xf32>
    %cst_11 = arith.constant dense<0.000000e+00> : vector<4x128xf32>
    %17 = tpu.matmul %3, %16, %cst_11 {dimension_numbers = #tpu.dot_dimension_numbers<[1], [0], [0], [1], [0, 0, 1, 1], [], []>} : vector<4x8xf32>, vector<8x128xf32>, vector<4x128xf32> -> vector<4x128xf32>
    %18 = vector.broadcast %6 : vector<4x1xf32> to vector<4x128xf32>
    %19 = arith.addf %17, %18 : vector<4x128xf32>
    %c0_12 = arith.constant 0 : index
    %c0_13 = arith.constant 0 : index
    %20 = vector.load %arg3[%c0_12, %c0_13] : memref<4x128xf32, #tpu.memory_space<vmem>>, vector<4x128xf32>
    tpu.vector_store %arg3[%c0_12, %c0_13], %19 {strides = array<i32>} : memref<4x128xf32, #tpu.memory_space<vmem>>, vector<4x128xf32>,
    return
  }
  func.func @transform_0(%arg0: i32) -> (i32, i32) {
    %c0_i32 = arith.constant 0 : i32
    %c0_i32_0 = arith.constant 0 : i32
    return %c0_i32, %arg0 : i32, i32
  }
  func.func @transform_1(%arg0: i32) -> (i32, i32) {
    %c0_i32 = arith.constant 0 : i32
    %c0_i32_0 = arith.constant 0 : i32
    %c0_i32_1 = arith.constant 0 : i32
    return %c0_i32, %c0_i32_0 : i32, i32
  }
  func.func @transform_2(%arg0: i32) -> (i32, i32) {
    %c0_i32 = arith.constant 0 : i32
    %c0_i32_0 = arith.constant 0 : i32
    return %c0_i32, %arg0 : i32, i32
  }
}

</mosaic_0001>

<bundles_post_ra>
// kernel: iris_classifier_forward.1
= control target key start
LH: loop header
LB: loop body
LE: loop exit
PB: predicated region body
PF: predicated region fallthrough
CT: control target
= control target key end

     0   :  { %vm26_vm0 = vcmask 1043456   ;;  %vm22_vm1 = vcmask 31744   ;;  %v297_v0 = vmov 0.0   ;;  %vm298_vm2 = vmmov 0   ;;  %s338_s0 = inlined_call_operand.vmem [shape: f32[4,128], index: 0, kind: input, shape index: {}]   ;;  %s339_s1 = inlined_call_operand.vmem [shape: f32[32,8], index: 1, kind: input, shape index: {}]   ;;  %s340_s2 = inlined_call_operand.vmem [shape: f32[4,128], index: 2, kind: output, shape index: {}]  }
   0x1   :  { %273 = vmatprep.subr.mxu0 %v297_v0  ;;  %v11_v1 = vld [vmem:[%s338_s0] sm:$0xf]  ;;  %275 = vmatprep.mubr.msk.f32.mxu0 %vm298_vm2, %v297_v0  ;;  %v15_v3 = vld [vmem:[%s339_s1 + $0x18] sm:$0xff]  ;;  %v299_v4 = vmov 0   ;;  %v300_v5 = vmov 1   ;;  %v13_v11 = vld [vmem:[%s339_s1 + $0x8] sm:$0xff] }
   0x2   :  { %v12_v2 = vld [vmem:[%s339_s1] sm:$0xff]  ;;  %274 = vmatpush3.msk.msra.mxu0 %vm26_vm0, %v11_v1  ;;  %293 = vset.pattern.permute.xlu0 %v299_v4  ;;  %vm105_vm3 = vcmask 64512   ;;  %v16_v12 = vld [vmem:[%s339_s1 + $0x18] sm:$0xf]  ;;  %v301_v13 = vmov 2  }
   0x3   :  { %276 = vmatmul.mubr.msk.f32.vlgmr.msra.gmra.mrb[0].mxu0 %vm22_vm1, %v12_v2  ;;  %19 = vperm.xlu0 %293, %v15_v3   ;;  %v14_v19 = vld [vmem:[%s339_s1 + $0x10] sm:$0xf] }
   0x4   :  { %278 = vmatprep.subr.mxu1 %v297_v0  ;;  %280 = vmatprep.mubr.msk.f32.mxu1 %vm298_vm2, %v297_v0 }
   0x5   :  { %283 = vmatprep.subr.mxu0 %v297_v0  ;;  %285 = vmatprep.mubr.msk.f32.mxu0 %vm298_vm2, %v297_v0 }
   0x6   :  { %295 = vset.pattern.permute.xlu1 %v301_v13 }
   0x7   :  { %294 = vset.pattern.permute.xlu0 %v300_v5  ;;  %182 = vperm.xlu1 %295, %v16_v12  }
   0x8   :  { %102 = vperm.xlu0 %294, %v15_v3  }
   0xc   :  { %296 = vset.pattern.permute.xlu0 %v301_v13 }
  0x82   :  { %v20_v6 = vpop.permute.xlu0 %19 }
  0x86   :  { %v183_v20 = vpop.permute.xlu1 %182 }
  0x87   :  { %v103_v14 = vpop.permute.xlu0 %102 }
  0xd6   :  { %v96_v7 = vpop.f32.mrb[0].mxu0 }
  0xd7   :  { %v97_v8 = vadd.f32 %v96_v7, %v20_v6  ;;  %v277_v9 = vpop.f32.mrb[1].mxu0 }
  0xd9   :  { %v100_v10 = vmax.f32 %v97_v8, 0.0 }
  0xdb   :  { %279 = vmatpush3.msra.mxu1 %v100_v10 }
  0xdc   :  { %281 = vmatmul.mubr.msk.f32.vlgmr.msra.gmra.mrb[0].mxu1 %vm105_vm3, %v13_v11 }
 0x1af   :  { %v175_v15 = vpop.f32.mrb[0].mxu1 }
 0x1b0   :  { %v176_v16 = vadd.f32 %v175_v15, %v103_v14  ;;  %v282_v17 = vpop.f32.mrb[1].mxu1 }
 0x1b2   :  { %v179_v18 = vmax.f32 %v176_v16, 0.0 }
 0x1b4   :  { %284 = vmatpush3.msra.mxu0 %v179_v18 }
 0x1b5   :  { %286 = vmatmul.mubr.msk.f32.vlgmr.msra.gmra.mrb[2].mxu0 %vm105_vm3, %v14_v19 }
 0x288   :  { %v254_v21 = vpop.f32.mrb[2].mxu0 }
 0x289   :  { %v255_v22 = vadd.f32 %v254_v21, %v183_v20  ;;  %v287_v23 = vpop.f32.mrb[3].mxu0 }
 0x28b   :  { %258 = vst [vmem:[%s340_s2] sm:$0xf] %v255_v22 }

</bundles_post_ra>
